<compile_context>
chip_gen: v7x
topology: tpu7x:2x2x1
jax: 0.10.0
libtpu: 0.0.40
codegen_flags: <defaults>
</compile_context>

<pallas_src>
import jax
import jax.numpy as jnp
import numpy as np
from jax import lax
from jax.experimental import pallas as pl
from jax.experimental.pallas import tpu as pltpu


_VMEM = pl.BlockSpec(memory_space=pltpu.MemorySpace.VMEM)


# --------------------------------------------------------------------------
# Kernel 1: rows_out = ReLU( cat([x, ReLU(x @ Ws^T + bs)]) @ Wr^T + br )
# Applied only to the gathered rows; the concat is fused by splitting Wr^T.
# --------------------------------------------------------------------------
def mlp_embed_kernel(x_ref, ws_t_ref, bs_ref, wr1_t_ref, wr2_t_ref, br_ref, out_ref):
    x = x_ref[...]                                                       # (T, E)
    share = jnp.maximum(
        jnp.dot(x, ws_t_ref[...], preferred_element_type=jnp.float32) + bs_ref[...],
        0.0)                                                             # (T, E)
    h = (jnp.dot(x, wr1_t_ref[...], preferred_element_type=jnp.float32)
         + jnp.dot(share, wr2_t_ref[...], preferred_element_type=jnp.float32)
         + br_ref[...])
    out_ref[...] = jnp.maximum(h, 0.0)                                   # (T, E)


def mlp_embed(rows, ws, bs, wr, br, tile_rows=512):
    """rows: (N,E) gathered user rows. ws: (E,E), wr: (E,2E) torch Linear weights."""
    n, e = rows.shape
    n_pad = ((n + 7) // 8) * 8
    if n_pad != n:
        rows = jnp.pad(rows, ((0, n_pad - n), (0, 0)))
    tile = min(((tile_rows + 7) // 8) * 8, n_pad)
    ws_t = ws.T                        # (E, E)
    wr_t = wr.T                        # (2E, E)
    wr1_t, wr2_t = wr_t[:e], wr_t[e:]  # each (E, E)

    out = pl.pallas_call(
        mlp_embed_kernel,
        out_shape=jax.ShapeDtypeStruct((n_pad, e), jnp.float32),
        grid=(pl.cdiv(n_pad, tile),),
        in_specs=[
            pl.BlockSpec((tile, e), lambda i: (i, 0)),   # rows: tiled over the grid
            pl.BlockSpec((e, e), lambda i: (0, 0)),      # weights: resident
            pl.BlockSpec((1, e), lambda i: (0, 0)),
            pl.BlockSpec((e, e), lambda i: (0, 0)),
            pl.BlockSpec((e, e), lambda i: (0, 0)),
            pl.BlockSpec((1, e), lambda i: (0, 0)),
        ],
        out_specs=pl.BlockSpec((tile, e), lambda i: (i, 0)),
        compiler_params=pltpu.CompilerParams(
            dimension_semantics=("parallel",),
            vmem_limit_bytes=32 * 1024 * 1024),
        cost_estimate=pl.CostEstimate(
            flops=6 * n_pad * e * e,
            transcendentals=0,
            bytes_accessed=4 * (2 * n_pad * e + 3 * e * e + 2 * e)),
    )(rows, ws_t, bs.reshape(1, e), wr1_t, wr2_t, br.reshape(1, e))
    return out[:n]


# --------------------------------------------------------------------------
# Kernel 2: SAMN friend memory attention + rating score (flag == 1 branch).
# Whole batch is processed in one invocation because the torch reference applies
# softmax over dim=0 (the batch axis).  Everything is lane-dense 2-D:
#   fe, f1, f2 : (B, F*E)     att_key, att_mem : (B, F*M)     hidden : (B, F*A)
# Per-friend contractions use block-diagonal weights kbd/mbd/wbd/ubd built with
# jnp.kron in the wrapper; segmented reductions / broadcasts over the E-lane
# segments use the constant matrices s_e (F*E,F), r_e (F,F*E), g (F*E,E).
# --------------------------------------------------------------------------
def samn_score_kernel(uid_ref, uidt_ref, iid_ref, fe_ref, fn_ref, fnm_ref,
                      kbd_ref, mbd_ref, wbd_ref, ba_ref, ubd_ref,
                      re_ref, se_ref, g_ref, out_ref):
    f32 = jnp.float32
    uid = uid_ref[...]                                   # (B, E)
    fe = fe_ref[...]                                     # (B, F*E)  already masked
    fn = fn_ref[...]                                     # (B, F)
    fn_m = fnm_ref[...]                                  # (B, F*M)

    # F.normalize(p=2): x / max(||x||, 1e-12) == x * rsqrt(max(||x||^2, 1e-24))
    inv_u = lax.rsqrt(jnp.maximum(
        jnp.sum(uid * uid, axis=1, keepdims=True), 1e-24))               # (B, 1)
    uidt_n = uidt_ref[...] * inv_u                                       # (B, F*E)

    sq = fe * fe
    nsq = jnp.dot(sq, se_ref[...], preferred_element_type=f32)           # (B, F)
    inv_f = lax.rsqrt(jnp.maximum(nsq, 1e-24))                           # (B, F)
    fe_n = fe * jnp.dot(inv_f, re_ref[...], preferred_element_type=f32)  # (B, F*E)

    cross = uidt_n * fe_n                                                # (B, F*E)
    att_key = jnp.dot(cross, kbd_ref[...], preferred_element_type=f32)   # (B, F*M)

    # softmax over dim=0 (batch axis), exactly as the torch code does
    mx = jnp.max(att_key, axis=0, keepdims=True)                         # (1, F*M)
    ex = jnp.exp(att_key - mx)
    denom = jnp.sum(ex, axis=0, keepdims=True)                           # >= 1
    att_mem = ex * pl.reciprocal(denom, approx=True) * fn_m              # (B, F*M)

    f1 = jnp.dot(att_mem, mbd_ref[...], preferred_element_type=f32)      # (B, F*E)
    f2 = f1 * fe                                                         # (B, F*E)

    hidden = jnp.maximum(
        jnp.dot(f2, wbd_ref[...], preferred_element_type=f32) + ba_ref[...], 0.0)
    fj = jnp.exp(jnp.dot(hidden, ubd_ref[...], preferred_element_type=f32)) * fn
    fsum = jnp.sum(fj, axis=1, keepdims=True) + 1e-8                     # (B, 1)
    fw = fj * pl.reciprocal(fsum, approx=True)                           # (B, F)
    fw_e = jnp.dot(fw, re_ref[...], preferred_element_type=f32)          # (B, F*E)

    friend = jnp.dot(fw_e * f2, g_ref[...], preferred_element_type=f32)  # (B, E)
    # dropout is identity in eval mode
    user = uid + friend
    out_ref[...] = jnp.sum(user * iid_ref[...], axis=1, keepdims=True)   # (B, 1)


def samn_score(uid, iid, frien_emb_flat, frien_num, Key, Mem, WA, BA, U_omega):
    """uid/iid: (B,E). frien_emb_flat: (B*F,E). frien_num: (B,F) float mask."""
    b, e = uid.shape
    f = frien_num.shape[1]
    m = Key.shape[1]
    a = WA.shape[1]
    f32 = jnp.float32

    # lane-dense wrapper-side layout plumbing (free in XLA)
    fe = (frien_emb_flat * frien_num.reshape(b * f, 1)).reshape(b, f * e)
    uid_t = jnp.tile(uid, (1, f))                       # (B, F*E)
    fn_m = jnp.repeat(frien_num, m, axis=1)             # (B, F*M)

    # block-diagonal / block-structured constant weights
    eye_f = jnp.eye(f, dtype=f32)
    k_bd = jnp.kron(eye_f, Key)                         # (F*E, F*M)
    m_bd = jnp.kron(eye_f, Mem)                         # (F*M, F*E)
    w_bd = jnp.kron(eye_f, WA)                          # (F*E, F*A)
    u_bd = jnp.kron(eye_f, U_omega)                     # (F*A, F)
    r_e = jnp.kron(eye_f, jnp.ones((1, e), f32))        # (F, F*E)  per-friend broadcast
    s_e = r_e.T                                         # (F*E, F)  per-friend lane-sum
    g_c = jnp.tile(jnp.eye(e, dtype=f32), (f, 1))       # (F*E, E)  sum over friends
    ba_t = jnp.tile(BA.reshape(1, a), (1, f))           # (1, F*A)

    args = (uid, uid_t, iid, fe, frien_num, fn_m,
            k_bd, m_bd, w_bd, ba_t, u_bd, r_e, s_e, g_c)
    bytes_accessed = 4 * (sum(int(x.size) for x in args) + b)
    flops = 2 * b * f * e * (f * m) * 2 + 2 * b * f * e * (f * a) \
        + 2 * b * f * a * f + 2 * b * f * e * f * 3 + 2 * b * f * e * e \
        + 30 * b * f * e
    transcendentals = b * (f * m + 2 * f + 2) + f * m

    out = pl.pallas_call(
        samn_score_kernel,
        out_shape=jax.ShapeDtypeStruct((b, 1), jnp.float32),
        in_specs=[_VMEM] * len(args),
        out_specs=_VMEM,
        compiler_params=pltpu.CompilerParams(vmem_limit_bytes=32 * 1024 * 1024),
        cost_estimate=pl.CostEstimate(
            flops=int(flops), transcendentals=int(transcendentals),
            bytes_accessed=int(bytes_accessed)),
    )(*args)
    return out.reshape(b)


# --------------------------------------------------------------------------
# Full forward (flag == 1): gathers + constant building in plain JAX, compute in Pallas.
# Only the B*(F+1) gathered user rows go through the shared-MLP transform.
# --------------------------------------------------------------------------
def samn_trust_forward_flag1(params, input_u, input_i, input_uf, user_num):
    b = input_u.shape[0]
    f = input_uf.shape[1]

    all_idx = jnp.concatenate([input_u, input_uf.reshape(-1)])            # (B*(F+1),)
    rows = params["u2e_r"][all_idx]                                       # gather first
    rows_t = mlp_embed(rows, params["mlp_w"], params["mlp_b"],
                       params["mlp_r_w"], params["mlp_r_b"])              # (B*(F+1), E)

    uid = rows_t[:b]                                                      # (B, E)
    frien_emb_flat = rows_t[b:]                                           # (B*F, E)
    iid = params["iidW"][input_i]                                         # (B, E)
    i_b = params["i_bias"][input_i]                                       # (B,)
    frien_num = (input_uf != user_num).astype(jnp.float32)                # (B, F)

    score = samn_score(uid, iid, frien_emb_flat, frien_num,
                       params["Key"], params["Mem"], params["WA"],
                       params["BA"], params["U_omega"])
    return score + i_b                                                    # i_bias in wrapper

# TODO(synk): flag==0/2 session branch needs GraphAttentionLayer + data.get_slice
# (undefined in the provided source) and the CE/BCE losses; not translated.


# --------------------------------------------------------------------------
# Pure-JAX reference of the same math (faithful to the torch code) for a check.
# --------------------------------------------------------------------------
def _reference(params, input_u, input_i, input_uf, user_num):
    u2e = params["u2e_r"]
    share = jax.nn.relu(u2e @ params["mlp_w"].T + params["mlp_b"])
    uidW_r = jax.nn.relu(jnp.concatenate([u2e, share], axis=1) @ params["mlp_r_w"].T
                         + params["mlp_r_b"])
    uid = uidW_r[input_u]
    iid = params["iidW"][input_i]
    i_b = params["i_bias"][input_i]
    fn = (input_uf != user_num).astype(jnp.float32)
    fe = uidW_r[input_uf] * fn[:, :, None]
    uid_n = uid / jnp.maximum(jnp.linalg.norm(uid, axis=1, keepdims=True), 1e-12)
    fe_n = fe / jnp.maximum(jnp.linalg.norm(fe, axis=2, keepdims=True), 1e-12)
    cross = uid_n[:, None, :] * fe_n
    att_key = jnp.einsum("abc,ck->abk", cross, params["Key"])
    att_mem = jax.nn.softmax(att_key, axis=0) * fn[:, :, None]
    f1 = jnp.einsum("abc,ck->abk", att_mem, params["Mem"])
    f2 = f1 * fe
    fj = jnp.exp(jnp.einsum(
        "abc,ck->abk",
        jax.nn.relu(jnp.einsum("abc,ck->abk", f2, params["WA"]) + params["BA"]),
        params["U_omega"]))
    fj = fj * fn[:, :, None]
    fw = fj / (jnp.sum(fj, axis=1, keepdims=True) + 1e-8)
    friend = jnp.sum(fw * f2, axis=1)
    user = uid + friend
    return jnp.sum(user * iid, axis=1) + i_b


if __name__ == "__main__":
    # Small shapes consistent with the module.
    user_num = 64
    item_num = 32
    E = 32          # embedding_size
    M = 8           # memory_size
    A = 16          # attention_size
    B = 8           # batch
    F = 8           # friends per user (padded with index == user_num)

    key = jax.random.PRNGKey(0)
    ks = jax.random.split(key, 12)

    def U(k, shape, lo, hi):
        return jax.random.uniform(k, shape, jnp.float32, lo, hi)

    params = {
        "u2e_r":   U(ks[0], (user_num + 1, E), -0.1, 0.1),
        "iidW":    U(ks[1], (item_num, E), -0.1, 0.1),
        "i_bias":  jnp.zeros((item_num,), jnp.float32),
        "Key":     U(ks[2], (E, M), -0.1, 0.1),
        "Mem":     jnp.ones((M, E), jnp.float32),            # uniform_(1.0, 1.0)
        "WA":      U(ks[3], (E, A), -0.1, 0.1),
        "BA":      jnp.zeros((A,), jnp.float32),
        "U_omega": U(ks[4], (A, 1), -0.1, 0.1),
        "mlp_w":   U(ks[5], (E, E), -0.1, 0.1),               # Linear_layer_s
        "mlp_b":   U(ks[6], (E,), -0.1, 0.1),
        "mlp_r_w": U(ks[7], (E, 2 * E), -0.1, 0.1),           # Linear_layer_r
        "mlp_r_b": U(ks[8], (E,), -0.1, 0.1),
    }

    input_u = jax.random.randint(ks[9], (B,), 0, user_num)
    input_i = jax.random.randint(ks[10], (B,), 0, item_num)
    input_uf = jax.random.randint(ks[11], (B, F), 0, user_num + 1)  # user_num = pad id

    score = samn_trust_forward_flag1(params, input_u, input_i, input_uf, user_num)
    score = jax.block_until_ready(score)

    ref = _reference(params, input_u, input_i, input_uf, user_num)
    # tolerance accounts for the approximate EUP reciprocals used in the kernel
    if not np.allclose(np.asarray(score), np.asarray(ref), rtol=5e-3, atol=5e-4):
        raise AssertionError("Pallas kernel result does not match JAX reference")

    print("KERNEL_OK")
</pallas_src>

<mosaic_0001>
module attributes {stable_mosaic.version = 11 : i64} {
  func.func @mlp_embed_kernel(%arg0: i32, %arg1: memref<72x32xf32, #tpu.memory_space<vmem>>, %arg2: memref<32x32xf32, #tpu.memory_space<vmem>>, %arg3: memref<1x32xf32, #tpu.memory_space<vmem>>, %arg4: memref<32x32xf32, #tpu.memory_space<vmem>>, %arg5: memref<32x32xf32, #tpu.memory_space<vmem>>, %arg6: memref<1x32xf32, #tpu.memory_space<vmem>>, %arg7: memref<72x32xf32, #tpu.memory_space<vmem>>) attributes {dimension_semantics = [#tpu.dimension_semantics<parallel>], iteration_bounds = array<i64: 1>, scalar_prefetch = 0 : i64, scratch_operands = 0 : i64, tpu.core_type = #tpu.core_type<tc>, window_params = [{transform_indices = @transform_0, window_bounds = array<i64: 72, 32>}, {pipeline_mode = #tpu.pipeline_mode<synchronous>, transform_indices = @transform_1, window_bounds = array<i64: 32, 32>}, {pipeline_mode = #tpu.pipeline_mode<synchronous>, transform_indices = @transform_2, window_bounds = array<i64: 1, 32>}, {pipeline_mode = #tpu.pipeline_mode<synchronous>, transform_indices = @transform_3, window_bounds = array<i64: 32, 32>}, {pipeline_mode = #tpu.pipeline_mode<synchronous>, transform_indices = @transform_4, window_bounds = array<i64: 32, 32>}, {pipeline_mode = #tpu.pipeline_mode<synchronous>, transform_indices = @transform_5, window_bounds = array<i64: 1, 32>}, {transform_indices = @transform_6, window_bounds = array<i64: 72, 32>}]} {
    %c0 = arith.constant 0 : index
    %c0_0 = arith.constant 0 : index
    %0 = vector.load %arg1[%c0, %c0_0] : memref<72x32xf32, #tpu.memory_space<vmem>>, vector<72x32xf32>
    %c0_1 = arith.constant 0 : index
    %c0_2 = arith.constant 0 : index
    %1 = vector.load %arg2[%c0_1, %c0_2] : memref<32x32xf32, #tpu.memory_space<vmem>>, vector<32x32xf32>
    %cst = arith.constant dense<0.000000e+00> : vector<72x32xf32>
    %2 = tpu.matmul %0, %1, %cst {dimension_numbers = #tpu.dot_dimension_numbers<[1], [0], [0], [1], [0, 0, 1, 1], [], []>} : vector<72x32xf32>, vector<32x32xf32>, vector<72x32xf32> -> vector<72x32xf32>
    %c0_3 = arith.constant 0 : index
    %c0_4 = arith.constant 0 : index
    %3 = vector.load %arg3[%c0_3, %c0_4] : memref<1x32xf32, #tpu.memory_space<vmem>>, vector<1x32xf32>
    %4 = vector.broadcast %3 : vector<1x32xf32> to vector<72x32xf32>
    %5 = arith.addf %2, %4 : vector<72x32xf32>
    %cst_5 = arith.constant 0.000000e+00 : f32
    %6 = vector.broadcast %cst_5 : f32 to vector<72x32xf32>
    %7 = arith.maximumf %5, %6 : vector<72x32xf32>
    %c0_6 = arith.constant 0 : index
    %c0_7 = arith.constant 0 : index
    %8 = vector.load %arg4[%c0_6, %c0_7] : memref<32x32xf32, #tpu.memory_space<vmem>>, vector<32x32xf32>
    %cst_8 = arith.constant dense<0.000000e+00> : vector<72x32xf32>
    %9 = tpu.matmul %0, %8, %cst_8 {dimension_numbers = #tpu.dot_dimension_numbers<[1], [0], [0], [1], [0, 0, 1, 1], [], []>} : vector<72x32xf32>, vector<32x32xf32>, vector<72x32xf32> -> vector<72x32xf32>
    %c0_9 = arith.constant 0 : index
    %c0_10 = arith.constant 0 : index
    %10 = vector.load %arg5[%c0_9, %c0_10] : memref<32x32xf32, #tpu.memory_space<vmem>>, vector<32x32xf32>
    %cst_11 = arith.constant dense<0.000000e+00> : vector<72x32xf32>
    %11 = tpu.matmul %7, %10, %cst_11 {dimension_numbers = #tpu.dot_dimension_numbers<[1], [0], [0], [1], [0, 0, 1, 1], [], []>} : vector<72x32xf32>, vector<32x32xf32>, vector<72x32xf32> -> vector<72x32xf32>
    %12 = arith.addf %9, %11 : vector<72x32xf32>
    %c0_12 = arith.constant 0 : index
    %c0_13 = arith.constant 0 : index
    %13 = vector.load %arg6[%c0_12, %c0_13] : memref<1x32xf32, #tpu.memory_space<vmem>>, vector<1x32xf32>
    %14 = vector.broadcast %13 : vector<1x32xf32> to vector<72x32xf32>
    %15 = arith.addf %12, %14 : vector<72x32xf32>
    %cst_14 = arith.constant 0.000000e+00 : f32
    %16 = vector.broadcast %cst_14 : f32 to vector<72x32xf32>
    %17 = arith.maximumf %15, %16 : vector<72x32xf32>
    %c0_15 = arith.constant 0 : index
    %c0_16 = arith.constant 0 : index
    %18 = vector.load %arg7[%c0_15, %c0_16] : memref<72x32xf32, #tpu.memory_space<vmem>>, vector<72x32xf32>
    tpu.vector_store %arg7[%c0_15, %c0_16], %17 {strides = array<i32>} : memref<72x32xf32, #tpu.memory_space<vmem>>, vector<72x32xf32>,
    return
  }
  func.func @transform_0(%arg0: i32) -> (i32, i32) {
    %c0_i32 = arith.constant 0 : i32
    %c0_i32_0 = arith.constant 0 : i32
    return %arg0, %c0_i32 : i32, i32
  }
  func.func @transform_1(%arg0: i32) -> (i32, i32) {
    %c0_i32 = arith.constant 0 : i32
    %c0_i32_0 = arith.constant 0 : i32
    %c0_i32_1 = arith.constant 0 : i32
    return %c0_i32, %c0_i32_0 : i32, i32
  }
  func.func @transform_2(%arg0: i32) -> (i32, i32) {
    %c0_i32 = arith.constant 0 : i32
    %c0_i32_0 = arith.constant 0 : i32
    %c0_i32_1 = arith.constant 0 : i32
    return %c0_i32, %c0_i32_0 : i32, i32
  }
  func.func @transform_3(%arg0: i32) -> (i32, i32) {
    %c0_i32 = arith.constant 0 : i32
    %c0_i32_0 = arith.constant 0 : i32
    %c0_i32_1 = arith.constant 0 : i32
    return %c0_i32, %c0_i32_0 : i32, i32
  }
  func.func @transform_4(%arg0: i32) -> (i32, i32) {
    %c0_i32 = arith.constant 0 : i32
    %c0_i32_0 = arith.constant 0 : i32
    %c0_i32_1 = arith.constant 0 : i32
    return %c0_i32, %c0_i32_0 : i32, i32
  }
  func.func @transform_5(%arg0: i32) -> (i32, i32) {
    %c0_i32 = arith.constant 0 : i32
    %c0_i32_0 = arith.constant 0 : i32
    %c0_i32_1 = arith.constant 0 : i32
    return %c0_i32, %c0_i32_0 : i32, i32
  }
  func.func @transform_6(%arg0: i32) -> (i32, i32) {
    %c0_i32 = arith.constant 0 : i32
    %c0_i32_0 = arith.constant 0 : i32
    return %arg0, %c0_i32 : i32, i32
  }
}

</mosaic_0001>

<bundles_post_ra>
// kernel: tpu_custom_call.1
= control target key start
LH: loop header
LB: loop body
LE: loop exit
PB: predicated region body
PF: predicated region fallthrough
CT: control target
= control target key end

     0   :  { %v681_v0 = vmov 0.0|0.0   ;;  %vm682_vm0 = vmmov 0   ;;  %v683_v4 = vmov 0.0   ;;  %vm43_vm1 = vcmask 261120   ;;  %s905_s1 = inlined_call_operand.vmem [shape: f32[32,32], index: 1, kind: input, shape index: {}]   ;;  %s906_s3 = inlined_call_operand.vmem [shape: f32[32,32], index: 3, kind: input, shape index: {}]   ;;  %s907_s4 = inlined_call_operand.vmem [shape: f32[32,32], index: 4, kind: input, shape index: {}]   ;;  %s908_s0 = inlined_call_operand.vmem [shape: f32[72,32], index: 0, kind: input, shape index: {}]   ;;  %s909_s2 = inlined_call_operand.vmem [shape: f32[1,32], index: 2, kind: input, shape index: {}]   ;;  %s910_s5 = inlined_call_operand.vmem [shape: f32[1,32], index: 5, kind: input, shape index: {}]   ;;  %s911_s6 = inlined_call_operand.vmem [shape: f32[72,32], index: 6, kind: output, shape index: {}]  }
   0x1   :  { %656 = vmatprep.subr.bf16.mxu0 %v681_v0  ;;  %v32_v1 = vld [vmem:[%s905_s1] sm:$0xff]  ;;  %v33_v2 = vld [vmem:[%s905_s1 + $0x8] sm:$0xff]  ;;  %v34_v3 = vld [vmem:[%s905_s1 + $0x10] sm:$0xff]  ;;  %559 = vmatprep.mubr.msk.f32.mxu0 %vm682_vm0, %v683_v4 }
   0x2   :  { %v657_v5 = vpack.c.bf16 %v33_v2, %v32_v1  ;;  %v35_v6 = vld [vmem:[%s905_s1 + $0x18] sm:$0xff]  ;;  %674 = vmatprep.subr.bf16.mxu1 %v681_v0  ;;  %574 = vmatprep.mubr.msk.f32.mxu1 %vm682_vm0, %v683_v4  ;;  %v190_v8 = vld [vmem:[%s906_s3] sm:$0xff]  ;;  %v191_v9 = vld [vmem:[%s906_s3 + $0x8] sm:$0xff] }
   0x3   :  { %v660_v7 = vpack.c.bf16 %v35_v6, %v34_v3  ;;  %v194_v10 = vld [vmem:[%s907_s4] sm:$0xff]  ;;  %v195_v11 = vld [vmem:[%s907_s4 + $0x8] sm:$0xff]  ;;  %v669_v14 = vpack.c.bf16 %v191_v9, %v190_v8  ;;  %v192_v16 = vld [vmem:[%s906_s3 + $0x10] sm:$0xff] }
   0x4   :  { %658 = vmatpush3.bf16.msra.mxu0 %v657_v5  ;;  %676 = vmatpush3.bf16.msra.mxu1 %v657_v5  ;;  %v23_v12 = vld [vmem:[%s908_s0] sm:$0xff]  ;;  %v28_v13 = vld [vmem:[%s908_s0 + $0x28] sm:$0xff]  ;;  %v663_v15 = vpack.c.bf16 %v195_v11, %v194_v10  ;;  %v193_v17 = vld [vmem:[%s906_s3 + $0x18] sm:$0xff] }
   0x5   :  { %659 = vmatprep.subr.bf16.mxu0 %v681_v0  ;;  %675 = vmatprep.subr.bf16.mxu1 %v681_v0  ;;  %v196_v18 = vld [vmem:[%s907_s4 + $0x10] sm:$0xff]  ;;  %v197_v19 = vld [vmem:[%s907_s4 + $0x18] sm:$0xff]  ;;  %v24_v20 = vld [vmem:[%s908_s0 + $0x8] sm:$0xff]  ;;  %v672_v22 = vpack.c.bf16 %v193_v17, %v192_v16 }
   0x6   :  { %v29_v21 = vld [vmem:[%s908_s0 + $0x30] sm:$0xff]  ;;  %v666_v23 = vpack.c.bf16 %v197_v19, %v196_v18  ;;  %v30_v25 = vld [vmem:[%s908_s0 + $0x38] sm:$0xff]  ;;  %v31_v27 = vld [vmem:[%s908_s0 + $0x40] sm:$0xff] }
   0x7   :  { %v25_v24 = vld [vmem:[%s908_s0 + $0x10] sm:$0xff]  ;;  %v26_v26 = vld [vmem:[%s908_s0 + $0x18] sm:$0xff]  ;;  %v27_v28 = vld [vmem:[%s908_s0 + $0x20] sm:$0xff] }
   0x8   :  { %661 = vmatpush3.bf16.msra.mxu0 %v660_v7  ;;  %677 = vmatpush3.bf16.msra.mxu1 %v660_v7  ;;  %v483_v29 = vld [vmem:[%s909_s2] ss:$0 sm:$0xff] }
   0x9   :  { %668 = vmatprep.subr.bf16.mxu0 %v681_v0  ;;  %662 = vmatprep.subr.bf16.mxu1 %v681_v0 }
   0xb   :  { %560 = vmatmul.mubr.msk.f32.vlgmr.msra.gmra.mrb[0].mxu0 %vm43_vm1, %v23_v12  ;;  %575 = vmatmul.mubr.msk.f32.vlgmr.msra.gmra.mrb[0].mxu1 %vm43_vm1, %v28_v13 }
   0xc   :  { %562 = vmatprep.mubr.msk.f32.mxu0 %vm682_vm0, %v683_v4  ;;  %577 = vmatprep.mubr.msk.f32.mxu1 %vm682_vm0, %v683_v4 }
   0xd   :  { %670 = vmatpush3.bf16.msra.mxu0 %v669_v14  ;;  %664 = vmatpush3.bf16.msra.mxu1 %v663_v15 }
   0xe   :  { %671 = vmatprep.subr.bf16.mxu0 %v681_v0  ;;  %665 = vmatprep.subr.bf16.mxu1 %v681_v0 }
   0xf   :  { %563 = vmatmul.mubr.msk.f32.gmra.mrb[2].mxu0 %vm43_vm1, %v24_v20  ;;  %578 = vmatmul.mubr.msk.f32.gmra.mrb[2].mxu1 %vm43_vm1, %v29_v21 }
  0x10   :  { %565 = vmatprep.mubr.msk.f32.mxu0 %vm682_vm0, %v683_v4  ;;  %580 = vmatprep.mubr.msk.f32.mxu1 %vm682_vm0, %v683_v4 }
  0x11   :  { %673 = vmatpush3.bf16.msra.mxu0 %v672_v22  ;;  %667 = vmatpush3.bf16.msra.mxu1 %v666_v23 }
  0x13   :  { %566 = vmatmul.mubr.msk.f32.gmra.mrb[4].mxu0 %vm43_vm1, %v25_v24  ;;  %581 = vmatmul.mubr.msk.f32.gmra.mrb[4].mxu1 %vm43_vm1, %v30_v25 }
  0x14   :  { %568 = vmatprep.mubr.msk.f32.mxu0 %vm682_vm0, %v683_v4  ;;  %583 = vmatprep.mubr.msk.f32.mxu1 %vm682_vm0, %v683_v4 }
  0x17   :  { %569 = vmatmul.mubr.msk.f32.gmra.mrb[6].mxu0 %vm43_vm1, %v26_v26  ;;  %584 = vmatmul.mubr.msk.f32.gmra.mrb[6].mxu1 %vm43_vm1, %v31_v27 }
  0x18   :  { %571 = vmatprep.mubr.msk.f32.mxu0 %vm682_vm0, %v683_v4  ;;  %594 = vmatprep.mubr.msk.f32.mxu1 %vm682_vm0, %v683_v4 }
  0x1b   :  { %572 = vmatmul.mubr.msk.f32.gmra.mrb[8].mxu0 %vm43_vm1, %v27_v28 }
  0x1c   :  { %629 = vmatprep.mubr.msk.f32.mxu0 %vm682_vm0, %v683_v4 }
  0x1f   :  { %630 = vmatmul.mubr.msk.f32.vlgmr.msra.gmra.mrb[10].mxu0 %vm43_vm1, %v23_v12 }
  0x20   :  { %632 = vmatprep.mubr.msk.f32.mxu0 %vm682_vm0, %v683_v4 }
  0x23   :  { %633 = vmatmul.mubr.msk.f32.gmra.mrb[12].mxu0 %vm43_vm1, %v24_v20 }
  0x24   :  { %635 = vmatprep.mubr.msk.f32.mxu0 %vm682_vm0, %v683_v4 }
  0x27   :  { %636 = vmatmul.mubr.msk.f32.gmra.mrb[14].mxu0 %vm43_vm1, %v25_v24 }
  0x28   :  { %638 = vmatprep.mubr.msk.f32.mxu0 %vm682_vm0, %v683_v4 }
  0x2b   :  { %639 = vmatmul.mubr.msk.f32.gmra.mrb[16].mxu0 %vm43_vm1, %v26_v26 }
  0x2c   :  { %641 = vmatprep.mubr.msk.f32.mxu0 %vm682_vm0, %v683_v4 }
  0x2f   :  { %642 = vmatmul.mubr.msk.f32.gmra.mrb[18].mxu0 %vm43_vm1, %v27_v28 }
  0x30   :  { %644 = vmatprep.mubr.msk.f32.mxu0 %vm682_vm0, %v683_v4 }
  0x33   :  { %645 = vmatmul.mubr.msk.f32.gmra.mrb[20].mxu0 %vm43_vm1, %v28_v13 }
  0x34   :  { %647 = vmatprep.mubr.msk.f32.mxu0 %vm682_vm0, %v683_v4 }
  0x37   :  { %648 = vmatmul.mubr.msk.f32.gmra.mrb[22].mxu0 %vm43_vm1, %v29_v21 }
  0x38   :  { %650 = vmatprep.mubr.msk.f32.mxu0 %vm682_vm0, %v683_v4 }
  0x3b   :  { %651 = vmatmul.mubr.msk.f32.gmra.mrb[24].mxu0 %vm43_vm1, %v30_v25 }
  0x3c   :  { %653 = vmatprep.mubr.msk.f32.mxu0 %vm682_vm0, %v683_v4 }
  0x3f   :  { %654 = vmatmul.mubr.msk.f32.gmra.mrb[26].mxu0 %vm43_vm1, %v31_v27 }
  0xde   :  { %v137_v30 = vpop.f32.mrb[0].mxu0  ;;  %v162_v31 = vpop.f32.mrb[0].mxu1 }
  0xdf   :  { %v138_v32 = vadd.f32 %v483_v29, %v137_v30  ;;  %v561_v33 = vpop.f32.mrb[1].mxu0  ;;  %v576_v34 = vpop.f32.mrb[1].mxu1  ;;  %v163_v57 = vadd.f32 %v483_v29, %v162_v31 }
  0xe1   :  { %v181_v35 = vmax.f32 %v138_v32, 0.0  ;;  %v186_v60 = vmax.f32 %v163_v57, 0.0 }
  0xe2   :  { %v142_v36 = vpop.f32.mrb[2].mxu0  ;;  %v167_v37 = vpop.f32.mrb[2].mxu1 }
  0xe3   :  { %v143_v38 = vadd.f32 %v483_v29, %v142_v36  ;;  %v564_v39 = vpop.f32.mrb[3].mxu0  ;;  %595 = vmatmul.mubr.msk.f32.vlgmr.msra.gmra.mrb[8].mxu1 %vm43_vm1, %v181_v35  ;;  %v579_v40 = vpop.f32.mrb[3].mxu1  ;;  %v168_v61 = vadd.f32 %v483_v29, %v167_v37 }
  0xe4   :  { %597 = vmatprep.mubr.msk.f32.mxu1 %vm682_vm0, %v683_v4 }
  0xe5   :  { %v182_v41 = vmax.f32 %v143_v38, 0.0  ;;  %v187_v63 = vmax.f32 %v168_v61, 0.0 }
  0xe6   :  { %v147_v42 = vpop.f32.mrb[4].mxu0  ;;  %v172_v43 = vpop.f32.mrb[4].mxu1 }
  0xe7   :  { %v148_v44 = vadd.f32 %v483_v29, %v147_v42  ;;  %v567_v45 = vpop.f32.mrb[5].mxu0  ;;  %598 = vmatmul.mubr.msk.f32.gmra.mrb[10].mxu1 %vm43_vm1, %v182_v41  ;;  %v582_v46 = vpop.f32.mrb[5].mxu1  ;;  %v173_v0 = vadd.f32 %v483_v29, %v172_v43 }
  0xe8   :  { %600 = vmatprep.mubr.msk.f32.mxu1 %vm682_vm0, %v683_v4 }
  0xe9   :  { %v183_v47 = vmax.f32 %v148_v44, 0.0  ;;  %v188_v1 = vmax.f32 %v173_v0, 0.0 }
  0xea   :  { %v152_v48 = vpop.f32.mrb[6].mxu0  ;;  %v177_v49 = vpop.f32.mrb[6].mxu1 }
  0xeb   :  { %v153_v50 = vadd.f32 %v483_v29, %v152_v48  ;;  %v570_v51 = vpop.f32.mrb[7].mxu0  ;;  %601 = vmatmul.mubr.msk.f32.gmra.mrb[12].mxu1 %vm43_vm1, %v183_v47  ;;  %v585_v52 = vpop.f32.mrb[7].mxu1  ;;  %v178_v2 = vadd.f32 %v483_v29, %v177_v49 }
  0xec   :  { %603 = vmatprep.mubr.msk.f32.mxu1 %vm682_vm0, %v683_v4 }
  0xed   :  { %v184_v53 = vmax.f32 %v153_v50, 0.0  ;;  %v189_v3 = vmax.f32 %v178_v2, 0.0 }
  0xee   :  { %v157_v54 = vpop.f32.mrb[8].mxu0 }
  0xef   :  { %v158_v55 = vadd.f32 %v483_v29, %v157_v54  ;;  %v573_v56 = vpop.f32.mrb[9].mxu0  ;;  %604 = vmatmul.mubr.msk.f32.gmra.mrb[14].mxu1 %vm43_vm1, %v184_v53 }
  0xf0   :  { %606 = vmatprep.mubr.msk.f32.mxu1 %vm682_vm0, %v683_v4 }
  0xf1   :  { %v185_v58 = vmax.f32 %v158_v55, 0.0 }
  0xf2   :  { %v401_v59 = vpop.f32.mrb[10].mxu0 }
  0xf3   :  { %607 = vmatmul.mubr.msk.f32.gmra.mrb[16].mxu1 %vm43_vm1, %v185_v58  ;;  %v631_v62 = vpop.f32.mrb[11].mxu0 }
  0xf4   :  { %609 = vmatprep.mubr.msk.f32.mxu1 %vm682_vm0, %v683_v4 }
  0xf6   :  { %v406_v5 = vpop.f32.mrb[12].mxu0 }
  0xf7   :  { %610 = vmatmul.mubr.msk.f32.gmra.mrb[18].mxu1 %vm43_vm1, %v186_v60  ;;  %v634_v6 = vpop.f32.mrb[13].mxu0 }
  0xf8   :  { %612 = vmatprep.mubr.msk.f32.mxu1 %vm682_vm0, %v683_v4 }
  0xfa   :  { %v411_v7 = vpop.f32.mrb[14].mxu0 }
  0xfb   :  { %613 = vmatmul.mubr.msk.f32.gmra.mrb[20].mxu1 %vm43_vm1, %v187_v63  ;;  %v637_v8 = vpop.f32.mrb[15].mxu0 }
  0xfc   :  { %615 = vmatprep.mubr.msk.f32.mxu1 %vm682_vm0, %v683_v4 }
  0xfe   :  { %v416_v9 = vpop.f32.mrb[16].mxu0 }
  0xff   :  { %616 = vmatmul.mubr.msk.f32.gmra.mrb[22].mxu1 %vm43_vm1, %v188_v1  ;;  %v640_v10 = vpop.f32.mrb[17].mxu0 }
 0x100   :  { %618 = vmatprep.mubr.msk.f32.mxu1 %vm682_vm0, %v683_v4  ;;  %v511_v4 = vld [vmem:[%s910_s5] ss:$0 sm:$0xff] }
 0x102   :  { %v421_v11 = vpop.f32.mrb[18].mxu0 }
 0x103   :  { %619 = vmatmul.mubr.msk.f32.gmra.mrb[24].mxu1 %vm43_vm1, %v189_v3  ;;  %v643_v12 = vpop.f32.mrb[19].mxu0 }
 0x106   :  { %v426_v13 = vpop.f32.mrb[20].mxu0 }
 0x107   :  { %v646_v14 = vpop.f32.mrb[21].mxu0 }
 0x10a   :  { %v431_v15 = vpop.f32.mrb[22].mxu0 }
 0x10b   :  { %v649_v16 = vpop.f32.mrb[23].mxu0 }
 0x10e   :  { %v436_v17 = vpop.f32.mrb[24].mxu0 }
 0x10f   :  { %v652_v18 = vpop.f32.mrb[25].mxu0 }
 0x112   :  { %v441_v19 = vpop.f32.mrb[26].mxu0 }
 0x113   :  { %v655_v20 = vpop.f32.mrb[27].mxu0 }
 0x1b6   :  { %v291_v21 = vpop.f32.mrb[8].mxu1 }
 0x1b7   :  { %v402_v22 = vadd.f32 %v401_v59, %v291_v21  ;;  %v596_v23 = vpop.f32.mrb[9].mxu1 }
 0x1b9   :  { %v452_v24 = vadd.f32 %v511_v4, %v402_v22 }
 0x1ba   :  { %v296_v25 = vpop.f32.mrb[10].mxu1 }
 0x1bb   :  { %v461_v26 = vmax.f32 %v452_v24, 0.0  ;;  %v407_v27 = vadd.f32 %v406_v5, %v296_v25  ;;  %v599_v28 = vpop.f32.mrb[11].mxu1 }
 0x1bd   :  { %470 = vst.msk [vmem:[%s911_s6] sm:$0xff] %vm43_vm1, %v461_v26  ;;  %v453_v29 = vadd.f32 %v511_v4, %v407_v27 }
 0x1be   :  { %v301_v30 = vpop.f32.mrb[12].mxu1 }
 0x1bf   :  { %v462_v31 = vmax.f32 %v453_v29, 0.0  ;;  %v412_v32 = vadd.f32 %v411_v7, %v301_v30  ;;  %v602_v33 = vpop.f32.mrb[13].mxu1 }
 0x1c1   :  { %471 = vst.msk [vmem:[%s911_s6 + $0x8] sm:$0xff] %vm43_vm1, %v462_v31  ;;  %v454_v34 = vadd.f32 %v511_v4, %v412_v32 }
 0x1c2   :  { %v306_v35 = vpop.f32.mrb[14].mxu1 }
 0x1c3   :  { %v463_v36 = vmax.f32 %v454_v34, 0.0  ;;  %v417_v37 = vadd.f32 %v416_v9, %v306_v35  ;;  %v605_v38 = vpop.f32.mrb[15].mxu1 }
 0x1c5   :  { %472 = vst.msk [vmem:[%s911_s6 + $0x10] sm:$0xff] %vm43_vm1, %v463_v36  ;;  %v455_v39 = vadd.f32 %v511_v4, %v417_v37 }
 0x1c6   :  { %v311_v40 = vpop.f32.mrb[16].mxu1 }
 0x1c7   :  { %v464_v41 = vmax.f32 %v455_v39, 0.0  ;;  %v422_v42 = vadd.f32 %v421_v11, %v311_v40  ;;  %v608_v43 = vpop.f32.mrb[17].mxu1 }
 0x1c9   :  { %473 = vst.msk [vmem:[%s911_s6 + $0x18] sm:$0xff] %vm43_vm1, %v464_v41  ;;  %v456_v44 = vadd.f32 %v511_v4, %v422_v42 }
 0x1ca   :  { %v316_v45 = vpop.f32.mrb[18].mxu1 }
 0x1cb   :  { %v465_v46 = vmax.f32 %v456_v44, 0.0  ;;  %v427_v47 = vadd.f32 %v426_v13, %v316_v45  ;;  %v611_v48 = vpop.f32.mrb[19].mxu1 }
 0x1cd   :  { %474 = vst.msk [vmem:[%s911_s6 + $0x20] sm:$0xff] %vm43_vm1, %v465_v46  ;;  %v457_v49 = vadd.f32 %v511_v4, %v427_v47 }
 0x1ce   :  { %v321_v50 = vpop.f32.mrb[20].mxu1 }
 0x1cf   :  { %v466_v51 = vmax.f32 %v457_v49, 0.0  ;;  %v432_v52 = vadd.f32 %v431_v15, %v321_v50  ;;  %v614_v53 = vpop.f32.mrb[21].mxu1 }
 0x1d1   :  { %475 = vst.msk [vmem:[%s911_s6 + $0x28] sm:$0xff] %vm43_vm1, %v466_v51  ;;  %v458_v54 = vadd.f32 %v511_v4, %v432_v52 }
 0x1d2   :  { %v326_v55 = vpop.f32.mrb[22].mxu1 }
 0x1d3   :  { %v467_v56 = vmax.f32 %v458_v54, 0.0  ;;  %v437_v57 = vadd.f32 %v436_v17, %v326_v55  ;;  %v617_v58 = vpop.f32.mrb[23].mxu1 }
 0x1d5   :  { %476 = vst.msk [vmem:[%s911_s6 + $0x30] sm:$0xff] %vm43_vm1, %v467_v56  ;;  %v459_v59 = vadd.f32 %v511_v4, %v437_v57 }
 0x1d6   :  { %v331_v60 = vpop.f32.mrb[24].mxu1 }
 0x1d7   :  { %v468_v61 = vmax.f32 %v459_v59, 0.0  ;;  %v442_v62 = vadd.f32 %v441_v19, %v331_v60  ;;  %v620_v63 = vpop.f32.mrb[25].mxu1 }
 0x1d9   :  { %477 = vst.msk [vmem:[%s911_s6 + $0x38] sm:$0xff] %vm43_vm1, %v468_v61  ;;  %v460_v0 = vadd.f32 %v511_v4, %v442_v62 }
 0x1db   :  { %v469_v1 = vmax.f32 %v460_v0, 0.0 }
 0x1dd   :  { %478 = vst.msk [vmem:[%s911_s6 + $0x40] sm:$0xff] %vm43_vm1, %v469_v1 }

</bundles_post_ra>
